<compile_context>
chip_gen: v6e
topology: v6e:2x2x1
jax: 0.10.0
libtpu: 0.0.40
codegen_flags: <defaults>
</compile_context>

<pallas_src>
import jax
import jax.numpy as jnp
from jax.experimental import pallas as pl

# ---------------- problem sizes (small, consistent with the module) ----------
VOCAB = 32       # one_step_decoder.input_output_dim
EMBED = 16
HIDDEN = 32
BATCH = 8
TARGET_LEN = 8


def _decoder_kernel(target0_ref, w_in_ref, w_hf_ref, b_fc_ref, h0_ref, c0_ref,
                    out_ref):
    H, V = HIDDEN, VOCAB

    # Hoisted constants / weights (loaded & broadcast once; JAX does not CSE
    # broadcast_in_dim, so keep these out of the unrolled loop).
    iota = jax.lax.broadcasted_iota(jnp.int32, (BATCH, V), 1)       # (B, V)
    w_in = w_in_ref[...]       # (V, 4H)   = emb @ w_ih + b, i/f/o cols * 0.5
    w_hf = w_hf_ref[...]       # (H, 4H+V) = [w_hh_scaled | w_fc]
    b_fc = jnp.broadcast_to(b_fc_ref[...], (BATCH, V))              # (B, V)

    # Initial carries: one-hot of target[0, :] and the provided LSTM state.
    onehot = (iota == target0_ref[...]).astype(jnp.float32)         # (B, V)
    c = c0_ref[...]                                                  # (B, H)
    # Prologue: gate contribution of the initial hidden (logit lanes unused).
    hf_g = jnp.dot(h0_ref[...], w_hf,
                   preferred_element_type=jnp.float32)[:, :4 * H]   # (B, 4H)

    # Whole greedy recurrence unrolled inside one kernel invocation.
    for t in range(TARGET_LEN):
        # ---- LSTM gates: 1 MXU launch + 1 VPU add (bias folded into w_in) --
        gates = jnp.dot(onehot, w_in, preferred_element_type=jnp.float32) + hf_g

        # Single EUP launch: i/f/o lanes hold x/2, so sigmoid(x)=0.5*tanh(x/2)+0.5.
        tg = jnp.tanh(gates)
        sg = 0.5 * tg + 0.5
        i_g = sg[:, 0 * H:1 * H]     # PyTorch gate order: i, f, g, o
        f_g = sg[:, 1 * H:2 * H]
        g_g = tg[:, 2 * H:3 * H]
        o_g = sg[:, 3 * H:4 * H]

        c = f_g * c + i_g * g_g
        h = o_g * jnp.tanh(c)

        # ---- fused hidden + fc projection: one MXU launch ------------------
        hf = jnp.dot(h, w_hf, preferred_element_type=jnp.float32)   # (B, 4H+V)
        hf_g = hf[:, :4 * H]            # next-step gate contribution (vreg 0)
        pred = hf[:, 4 * H:] + b_fc     # this step's logits          (vreg 1)

        # ---- lane-dense output slab: column block t of (B, T*V) ------------
        out_ref[:, t * V:(t + 1) * V] = pred

        # ---- greedy argmax -> next-input one-hot (1 XLU reduce + 1 compare) -
        m = jnp.max(pred, axis=1, keepdims=True)
        # TODO(synk): an exact f32 logit tie (probability ~0 for continuous
        # logits) would yield a multi-hot input here instead of PyTorch's
        # first-index tie break.
        onehot = (pred == m).astype(jnp.float32)


def decoder_forward(target, hidden, cell, params):
    """target: (T, B) int; hidden, cell: (B, H) f32 -> (T, B, V) f32."""
    emb, w_ih, w_hh, b, w_fc, b_fc = params
    H, V, T, B = HIDDEN, VOCAB, TARGET_LEN, BATCH
    hp = jax.lax.Precision.HIGHEST

    # Column scale: 0.5 on i/f/o gate columns (sigmoid via tanh), 1.0 on g.
    gate_scale = jnp.concatenate(
        [jnp.full((1, H), 0.5, jnp.float32),
         jnp.full((1, H), 0.5, jnp.float32),
         jnp.ones((1, H), jnp.float32),
         jnp.full((1, H), 0.5, jnp.float32)], axis=1)                # (1, 4H)

    # Embedding folded into the input projection; combined LSTM bias folded
    # into every row of it (valid: one-hot LHS rows sum to exactly 1).
    #   onehot @ (emb @ w_ih + 1*b) == embedding(tok) @ w_ih + b
    w_in = (jnp.dot(emb, w_ih, precision=hp) + b) * gate_scale       # (V, 4H)
    # Hidden-state and fc projections fused into one RHS: [w_hh_scaled | w_fc].
    w_hf = jnp.concatenate([w_hh * gate_scale, w_fc], axis=1)        # (H, 4H+V)

    target0 = target[0, :].astype(jnp.int32).reshape(B, 1)

    out = pl.pallas_call(
        _decoder_kernel,
        out_shape=jax.ShapeDtypeStruct((B, T * V), jnp.float32),
        # No grid / BlockSpecs: single invocation, every operand is a full
        # VMEM-resident block (total resident data is a few KiB).
    )(target0, w_in, w_hf, b_fc, hidden, cell)

    # (B, T*V) lane-dense slab -> (T, B, V), matching the PyTorch module.
    return out.reshape(B, T, V).transpose(1, 0, 2)


def init_params(key):
    k = jax.random.split(key, 6)
    s = 0.1
    emb = s * jax.random.normal(k[0], (VOCAB, EMBED), jnp.float32)
    w_ih = s * jax.random.normal(k[1], (EMBED, 4 * HIDDEN), jnp.float32)
    w_hh = s * jax.random.normal(k[2], (HIDDEN, 4 * HIDDEN), jnp.float32)
    b = s * jax.random.normal(k[3], (1, 4 * HIDDEN), jnp.float32)
    w_fc = s * jax.random.normal(k[4], (HIDDEN, VOCAB), jnp.float32)
    b_fc = s * jax.random.normal(k[5], (1, VOCAB), jnp.float32)
    return emb, w_ih, w_hh, b, w_fc, b_fc


if __name__ == "__main__":
    key = jax.random.PRNGKey(0)
    kp, kt, kh, kc = jax.random.split(key, 4)

    params = init_params(kp)
    target = jax.random.randint(kt, (TARGET_LEN, BATCH), 0, VOCAB, jnp.int32)
    hidden = 0.1 * jax.random.normal(kh, (BATCH, HIDDEN), jnp.float32)
    cell = 0.1 * jax.random.normal(kc, (BATCH, HIDDEN), jnp.float32)

    preds = decoder_forward(target, hidden, cell, params)
    preds = jax.block_until_ready(preds)

    assert preds.shape == (TARGET_LEN, BATCH, VOCAB)
    assert preds.dtype == jnp.float32
    assert bool(jnp.all(jnp.isfinite(preds)))
    print("KERNEL_OK")
</pallas_src>

<mosaic_0001>
module attributes {stable_mosaic.version = 11 : i64} {
  func.func @_decoder_kernel(%arg0: memref<8x1xi32, #tpu.memory_space<vmem>>, %arg1: memref<32x128xf32, #tpu.memory_space<vmem>>, %arg2: memref<32x160xf32, #tpu.memory_space<vmem>>, %arg3: memref<1x32xf32, #tpu.memory_space<vmem>>, %arg4: memref<8x32xf32, #tpu.memory_space<vmem>>, %arg5: memref<8x32xf32, #tpu.memory_space<vmem>>, %arg6: memref<8x256xf32, #tpu.memory_space<vmem>>) attributes {dimension_semantics = [], scalar_prefetch = 0 : i64, scratch_operands = 0 : i64, tpu.core_type = #tpu.core_type<tc>} {
    %0 = tpu.iota {dimensions = array<i32: 1>} : vector<8x32xi32>
    %c0 = arith.constant 0 : index
    %c0_0 = arith.constant 0 : index
    %1 = vector.load %arg1[%c0, %c0_0] : memref<32x128xf32, #tpu.memory_space<vmem>>, vector<32x128xf32>
    %c0_1 = arith.constant 0 : index
    %c0_2 = arith.constant 0 : index
    %2 = vector.load %arg2[%c0_1, %c0_2] : memref<32x160xf32, #tpu.memory_space<vmem>>, vector<32x160xf32>
    %c0_3 = arith.constant 0 : index
    %c0_4 = arith.constant 0 : index
    %3 = vector.load %arg3[%c0_3, %c0_4] : memref<1x32xf32, #tpu.memory_space<vmem>>, vector<1x32xf32>
    %4 = vector.shape_cast %3 : vector<1x32xf32> to vector<1x32xf32>
    %5 = vector.broadcast %4 : vector<1x32xf32> to vector<8x32xf32>
    %c0_5 = arith.constant 0 : index
    %c0_6 = arith.constant 0 : index
    %6 = vector.load %arg0[%c0_5, %c0_6] : memref<8x1xi32, #tpu.memory_space<vmem>>, vector<8x1xi32>
    %7 = vector.broadcast %6 : vector<8x1xi32> to vector<8x32xi32>
    %8 = arith.cmpi eq, %0, %7 : vector<8x32xi32>
    %9 = arith.extui %8 : vector<8x32xi1> to vector<8x32xi32>
    %10 = arith.sitofp %9 : vector<8x32xi32> to vector<8x32xf32>
    %c0_7 = arith.constant 0 : index
    %c0_8 = arith.constant 0 : index
    %11 = vector.load %arg5[%c0_7, %c0_8] : memref<8x32xf32, #tpu.memory_space<vmem>>, vector<8x32xf32>
    %c0_9 = arith.constant 0 : index
    %c0_10 = arith.constant 0 : index
    %12 = vector.load %arg4[%c0_9, %c0_10] : memref<8x32xf32, #tpu.memory_space<vmem>>, vector<8x32xf32>
    %cst = arith.constant dense<0.000000e+00> : vector<8x160xf32>
    %13 = tpu.matmul %12, %2, %cst {dimension_numbers = #tpu.dot_dimension_numbers<[1], [0], [0], [1], [0, 0, 1, 1], [], []>} : vector<8x32xf32>, vector<32x160xf32>, vector<8x160xf32> -> vector<8x160xf32>
    %14 = vector.extract_strided_slice %13 {offsets = [0, 0], sizes = [8, 128], strides = [1, 1]} : vector<8x160xf32> to vector<8x128xf32>
    %cst_11 = arith.constant dense<0.000000e+00> : vector<8x128xf32>
    %15 = tpu.matmul %10, %1, %cst_11 {dimension_numbers = #tpu.dot_dimension_numbers<[1], [0], [0], [1], [0, 0, 1, 1], [], []>} : vector<8x32xf32>, vector<32x128xf32>, vector<8x128xf32> -> vector<8x128xf32>
    %16 = arith.addf %15, %14 : vector<8x128xf32>
    %17 = math.tanh %16 : vector<8x128xf32>
    %cst_12 = arith.constant 5.000000e-01 : f32
    %18 = vector.broadcast %cst_12 : f32 to vector<8x128xf32>
    %19 = arith.mulf %18, %17 : vector<8x128xf32>
    %cst_13 = arith.constant 5.000000e-01 : f32
    %20 = vector.broadcast %cst_13 : f32 to vector<8x128xf32>
    %21 = arith.addf %19, %20 : vector<8x128xf32>
    %22 = vector.extract_strided_slice %21 {offsets = [0, 0], sizes = [8, 32], strides = [1, 1]} : vector<8x128xf32> to vector<8x32xf32>
    %23 = vector.extract_strided_slice %21 {offsets = [0, 32], sizes = [8, 32], strides = [1, 1]} : vector<8x128xf32> to vector<8x32xf32>
    %24 = vector.extract_strided_slice %17 {offsets = [0, 64], sizes = [8, 32], strides = [1, 1]} : vector<8x128xf32> to vector<8x32xf32>
    %25 = vector.extract_strided_slice %21 {offsets = [0, 96], sizes = [8, 32], strides = [1, 1]} : vector<8x128xf32> to vector<8x32xf32>
    %26 = arith.mulf %23, %11 : vector<8x32xf32>
    %27 = arith.mulf %22, %24 : vector<8x32xf32>
    %28 = arith.addf %26, %27 : vector<8x32xf32>
    %29 = math.tanh %28 : vector<8x32xf32>
    %30 = arith.mulf %25, %29 : vector<8x32xf32>
    %cst_14 = arith.constant dense<0.000000e+00> : vector<8x160xf32>
    %31 = tpu.matmul %30, %2, %cst_14 {dimension_numbers = #tpu.dot_dimension_numbers<[1], [0], [0], [1], [0, 0, 1, 1], [], []>} : vector<8x32xf32>, vector<32x160xf32>, vector<8x160xf32> -> vector<8x160xf32>
    %32 = vector.extract_strided_slice %31 {offsets = [0, 0], sizes = [8, 128], strides = [1, 1]} : vector<8x160xf32> to vector<8x128xf32>
    %33 = vector.extract_strided_slice %31 {offsets = [0, 128], sizes = [8, 32], strides = [1, 1]} : vector<8x160xf32> to vector<8x32xf32>
    %34 = arith.addf %33, %5 : vector<8x32xf32>
    %c0_15 = arith.constant 0 : index
    %c0_16 = arith.constant 0 : index
    %35 = vector.load %arg6[%c0_15, %c0_16] : memref<8x256xf32, #tpu.memory_space<vmem>>, vector<8x32xf32>
    tpu.vector_store %arg6[%c0_15, %c0_16], %34 {strides = array<i32>} : memref<8x256xf32, #tpu.memory_space<vmem>>, vector<8x32xf32>,
    %cst_17 = arith.constant dense<0xFF800000> : vector<8xf32>
    %36 = vector.multi_reduction <maximumf>, %34, %cst_17 [1] : vector<8x32xf32> to vector<8xf32>
    %37 = vector.shape_cast %36 : vector<8xf32> to vector<8x1xf32>
    %38 = vector.broadcast %37 : vector<8x1xf32> to vector<8x32xf32>
    %39 = arith.cmpf oeq, %34, %38 : vector<8x32xf32>
    %40 = arith.extui %39 : vector<8x32xi1> to vector<8x32xi32>
    %41 = arith.sitofp %40 : vector<8x32xi32> to vector<8x32xf32>
    %cst_18 = arith.constant dense<0.000000e+00> : vector<8x128xf32>
    %42 = tpu.matmul %41, %1, %cst_18 {dimension_numbers = #tpu.dot_dimension_numbers<[1], [0], [0], [1], [0, 0, 1, 1], [], []>} : vector<8x32xf32>, vector<32x128xf32>, vector<8x128xf32> -> vector<8x128xf32>
    %43 = arith.addf %42, %32 : vector<8x128xf32>
    %44 = math.tanh %43 : vector<8x128xf32>
    %cst_19 = arith.constant 5.000000e-01 : f32
    %45 = vector.broadcast %cst_19 : f32 to vector<8x128xf32>
    %46 = arith.mulf %45, %44 : vector<8x128xf32>
    %cst_20 = arith.constant 5.000000e-01 : f32
    %47 = vector.broadcast %cst_20 : f32 to vector<8x128xf32>
    %48 = arith.addf %46, %47 : vector<8x128xf32>
    %49 = vector.extract_strided_slice %48 {offsets = [0, 0], sizes = [8, 32], strides = [1, 1]} : vector<8x128xf32> to vector<8x32xf32>
    %50 = vector.extract_strided_slice %48 {offsets = [0, 32], sizes = [8, 32], strides = [1, 1]} : vector<8x128xf32> to vector<8x32xf32>
    %51 = vector.extract_strided_slice %44 {offsets = [0, 64], sizes = [8, 32], strides = [1, 1]} : vector<8x128xf32> to vector<8x32xf32>
    %52 = vector.extract_strided_slice %48 {offsets = [0, 96], sizes = [8, 32], strides = [1, 1]} : vector<8x128xf32> to vector<8x32xf32>
    %53 = arith.mulf %50, %28 : vector<8x32xf32>
    %54 = arith.mulf %49, %51 : vector<8x32xf32>
    %55 = arith.addf %53, %54 : vector<8x32xf32>
    %56 = math.tanh %55 : vector<8x32xf32>
    %57 = arith.mulf %52, %56 : vector<8x32xf32>
    %cst_21 = arith.constant dense<0.000000e+00> : vector<8x160xf32>
    %58 = tpu.matmul %57, %2, %cst_21 {dimension_numbers = #tpu.dot_dimension_numbers<[1], [0], [0], [1], [0, 0, 1, 1], [], []>} : vector<8x32xf32>, vector<32x160xf32>, vector<8x160xf32> -> vector<8x160xf32>
    %59 = vector.extract_strided_slice %58 {offsets = [0, 0], sizes = [8, 128], strides = [1, 1]} : vector<8x160xf32> to vector<8x128xf32>
    %60 = vector.extract_strided_slice %58 {offsets = [0, 128], sizes = [8, 32], strides = [1, 1]} : vector<8x160xf32> to vector<8x32xf32>
    %61 = arith.addf %60, %5 : vector<8x32xf32>
    %c0_22 = arith.constant 0 : index
    %c32 = arith.constant 32 : index
    %62 = vector.load %arg6[%c0_22, %c32] : memref<8x256xf32, #tpu.memory_space<vmem>>, vector<8x32xf32>
    tpu.vector_store %arg6[%c0_22, %c32], %61 {strides = array<i32>} : memref<8x256xf32, #tpu.memory_space<vmem>>, vector<8x32xf32>,
    %cst_23 = arith.constant dense<0xFF800000> : vector<8xf32>
    %63 = vector.multi_reduction <maximumf>, %61, %cst_23 [1] : vector<8x32xf32> to vector<8xf32>
    %64 = vector.shape_cast %63 : vector<8xf32> to vector<8x1xf32>
    %65 = vector.broadcast %64 : vector<8x1xf32> to vector<8x32xf32>
    %66 = arith.cmpf oeq, %61, %65 : vector<8x32xf32>
    %67 = arith.extui %66 : vector<8x32xi1> to vector<8x32xi32>
    %68 = arith.sitofp %67 : vector<8x32xi32> to vector<8x32xf32>
    %cst_24 = arith.constant dense<0.000000e+00> : vector<8x128xf32>
    %69 = tpu.matmul %68, %1, %cst_24 {dimension_numbers = #tpu.dot_dimension_numbers<[1], [0], [0], [1], [0, 0, 1, 1], [], []>} : vector<8x32xf32>, vector<32x128xf32>, vector<8x128xf32> -> vector<8x128xf32>
    %70 = arith.addf %69, %59 : vector<8x128xf32>
    %71 = math.tanh %70 : vector<8x128xf32>
    %cst_25 = arith.constant 5.000000e-01 : f32
    %72 = vector.broadcast %cst_25 : f32 to vector<8x128xf32>
    %73 = arith.mulf %72, %71 : vector<8x128xf32>
    %cst_26 = arith.constant 5.000000e-01 : f32
    %74 = vector.broadcast %cst_26 : f32 to vector<8x128xf32>
    %75 = arith.addf %73, %74 : vector<8x128xf32>
    %76 = vector.extract_strided_slice %75 {offsets = [0, 0], sizes = [8, 32], strides = [1, 1]} : vector<8x128xf32> to vector<8x32xf32>
    %77 = vector.extract_strided_slice %75 {offsets = [0, 32], sizes = [8, 32], strides = [1, 1]} : vector<8x128xf32> to vector<8x32xf32>
    %78 = vector.extract_strided_slice %71 {offsets = [0, 64], sizes = [8, 32], strides = [1, 1]} : vector<8x128xf32> to vector<8x32xf32>
    %79 = vector.extract_strided_slice %75 {offsets = [0, 96], sizes = [8, 32], strides = [1, 1]} : vector<8x128xf32> to vector<8x32xf32>
    %80 = arith.mulf %77, %55 : vector<8x32xf32>
    %81 = arith.mulf %76, %78 : vector<8x32xf32>
    %82 = arith.addf %80, %81 : vector<8x32xf32>
    %83 = math.tanh %82 : vector<8x32xf32>
    %84 = arith.mulf %79, %83 : vector<8x32xf32>
    %cst_27 = arith.constant dense<0.000000e+00> : vector<8x160xf32>
    %85 = tpu.matmul %84, %2, %cst_27 {dimension_numbers = #tpu.dot_dimension_numbers<[1], [0], [0], [1], [0, 0, 1, 1], [], []>} : vector<8x32xf32>, vector<32x160xf32>, vector<8x160xf32> -> vector<8x160xf32>
    %86 = vector.extract_strided_slice %85 {offsets = [0, 0], sizes = [8, 128], strides = [1, 1]} : vector<8x160xf32> to vector<8x128xf32>
    %87 = vector.extract_strided_slice %85 {offsets = [0, 128], sizes = [8, 32], strides = [1, 1]} : vector<8x160xf32> to vector<8x32xf32>
    %88 = arith.addf %87, %5 : vector<8x32xf32>
    %c0_28 = arith.constant 0 : index
    %c64 = arith.constant 64 : index
    %89 = vector.load %arg6[%c0_28, %c64] : memref<8x256xf32, #tpu.memory_space<vmem>>, vector<8x32xf32>
    tpu.vector_store %arg6[%c0_28, %c64], %88 {strides = array<i32>} : memref<8x256xf32, #tpu.memory_space<vmem>>, vector<8x32xf32>,
    %cst_29 = arith.constant dense<0xFF800000> : vector<8xf32>
    %90 = vector.multi_reduction <maximumf>, %88, %cst_29 [1] : vector<8x32xf32> to vector<8xf32>
    %91 = vector.shape_cast %90 : vector<8xf32> to vector<8x1xf32>
    %92 = vector.broadcast %91 : vector<8x1xf32> to vector<8x32xf32>
    %93 = arith.cmpf oeq, %88, %92 : vector<8x32xf32>
    %94 = arith.extui %93 : vector<8x32xi1> to vector<8x32xi32>
    %95 = arith.sitofp %94 : vector<8x32xi32> to vector<8x32xf32>
    %cst_30 = arith.constant dense<0.000000e+00> : vector<8x128xf32>
    %96 = tpu.matmul %95, %1, %cst_30 {dimension_numbers = #tpu.dot_dimension_numbers<[1], [0], [0], [1], [0, 0, 1, 1], [], []>} : vector<8x32xf32>, vector<32x128xf32>, vector<8x128xf32> -> vector<8x128xf32>
    %97 = arith.addf %96, %86 : vector<8x128xf32>
    %98 = math.tanh %97 : vector<8x128xf32>
    %cst_31 = arith.constant 5.000000e-01 : f32
    %99 = vector.broadcast %cst_31 : f32 to vector<8x128xf32>
    %100 = arith.mulf %99, %98 : vector<8x128xf32>
    %cst_32 = arith.constant 5.000000e-01 : f32
    %101 = vector.broadcast %cst_32 : f32 to vector<8x128xf32>
    %102 = arith.addf %100, %101 : vector<8x128xf32>
    %103 = vector.extract_strided_slice %102 {offsets = [0, 0], sizes = [8, 32], strides = [1, 1]} : vector<8x128xf32> to vector<8x32xf32>
    %104 = vector.extract_strided_slice %102 {offsets = [0, 32], sizes = [8, 32], strides = [1, 1]} : vector<8x128xf32> to vector<8x32xf32>
    %105 = vector.extract_strided_slice %98 {offsets = [0, 64], sizes = [8, 32], strides = [1, 1]} : vector<8x128xf32> to vector<8x32xf32>
    %106 = vector.extract_strided_slice %102 {offsets = [0, 96], sizes = [8, 32], strides = [1, 1]} : vector<8x128xf32> to vector<8x32xf32>
    %107 = arith.mulf %104, %82 : vector<8x32xf32>
    %108 = arith.mulf %103, %105 : vector<8x32xf32>
    %109 = arith.addf %107, %108 : vector<8x32xf32>
    %110 = math.tanh %109 : vector<8x32xf32>
    %111 = arith.mulf %106, %110 : vector<8x32xf32>
    %cst_33 = arith.constant dense<0.000000e+00> : vector<8x160xf32>
    %112 = tpu.matmul %111, %2, %cst_33 {dimension_numbers = #tpu.dot_dimension_numbers<[1], [0], [0], [1], [0, 0, 1, 1], [], []>} : vector<8x32xf32>, vector<32x160xf32>, vector<8x160xf32> -> vector<8x160xf32>
    %113 = vector.extract_strided_slice %112 {offsets = [0, 0], sizes = [8, 128], strides = [1, 1]} : vector<8x160xf32> to vector<8x128xf32>
    %114 = vector.extract_strided_slice %112 {offsets = [0, 128], sizes = [8, 32], strides = [1, 1]} : vector<8x160xf32> to vector<8x32xf32>
    %115 = arith.addf %114, %5 : vector<8x32xf32>
    %c0_34 = arith.constant 0 : index
    %c96 = arith.constant 96 : index
    %116 = vector.load %arg6[%c0_34, %c96] : memref<8x256xf32, #tpu.memory_space<vmem>>, vector<8x32xf32>
    tpu.vector_store %arg6[%c0_34, %c96], %115 {strides = array<i32>} : memref<8x256xf32, #tpu.memory_space<vmem>>, vector<8x32xf32>,
    %cst_35 = arith.constant dense<0xFF800000> : vector<8xf32>
    %117 = vector.multi_reduction <maximumf>, %115, %cst_35 [1] : vector<8x32xf32> to vector<8xf32>
    %118 = vector.shape_cast %117 : vector<8xf32> to vector<8x1xf32>
    %119 = vector.broadcast %118 : vector<8x1xf32> to vector<8x32xf32>
    %120 = arith.cmpf oeq, %115, %119 : vector<8x32xf32>
    %121 = arith.extui %120 : vector<8x32xi1> to vector<8x32xi32>
    %122 = arith.sitofp %121 : vector<8x32xi32> to vector<8x32xf32>
    %cst_36 = arith.constant dense<0.000000e+00> : vector<8x128xf32>
    %123 = tpu.matmul %122, %1, %cst_36 {dimension_numbers = #tpu.dot_dimension_numbers<[1], [0], [0], [1], [0, 0, 1, 1], [], []>} : vector<8x32xf32>, vector<32x128xf32>, vector<8x128xf32> -> vector<8x128xf32>
    %124 = arith.addf %123, %113 : vector<8x128xf32>
    %125 = math.tanh %124 : vector<8x128xf32>
    %cst_37 = arith.constant 5.000000e-01 : f32
    %126 = vector.broadcast %cst_37 : f32 to vector<8x128xf32>
    %127 = arith.mulf %126, %125 : vector<8x128xf32>
    %cst_38 = arith.constant 5.000000e-01 : f32
    %128 = vector.broadcast %cst_38 : f32 to vector<8x128xf32>
    %129 = arith.addf %127, %128 : vector<8x128xf32>
    %130 = vector.extract_strided_slice %129 {offsets = [0, 0], sizes = [8, 32], strides = [1, 1]} : vector<8x128xf32> to vector<8x32xf32>
    %131 = vector.extract_strided_slice %129 {offsets = [0, 32], sizes = [8, 32], strides = [1, 1]} : vector<8x128xf32> to vector<8x32xf32>
    %132 = vector.extract_strided_slice %125 {offsets = [0, 64], sizes = [8, 32], strides = [1, 1]} : vector<8x128xf32> to vector<8x32xf32>
    %133 = vector.extract_strided_slice %129 {offsets = [0, 96], sizes = [8, 32], strides = [1, 1]} : vector<8x128xf32> to vector<8x32xf32>
    %134 = arith.mulf %131, %109 : vector<8x32xf32>
    %135 = arith.mulf %130, %132 : vector<8x32xf32>
    %136 = arith.addf %134, %135 : vector<8x32xf32>
    %137 = math.tanh %136 : vector<8x32xf32>
    %138 = arith.mulf %133, %137 : vector<8x32xf32>
    %cst_39 = arith.constant dense<0.000000e+00> : vector<8x160xf32>
    %139 = tpu.matmul %138, %2, %cst_39 {dimension_numbers = #tpu.dot_dimension_numbers<[1], [0], [0], [1], [0, 0, 1, 1], [], []>} : vector<8x32xf32>, vector<32x160xf32>, vector<8x160xf32> -> vector<8x160xf32>
    %140 = vector.extract_strided_slice %139 {offsets = [0, 0], sizes = [8, 128], strides = [1, 1]} : vector<8x160xf32> to vector<8x128xf32>
    %141 = vector.extract_strided_slice %139 {offsets = [0, 128], sizes = [8, 32], strides = [1, 1]} : vector<8x160xf32> to vector<8x32xf32>
    %142 = arith.addf %141, %5 : vector<8x32xf32>
    %c0_40 = arith.constant 0 : index
    %c128 = arith.constant 128 : index
    %143 = vector.load %arg6[%c0_40, %c128] : memref<8x256xf32, #tpu.memory_space<vmem>>, vector<8x32xf32>
    tpu.vector_store %arg6[%c0_40, %c128], %142 {strides = array<i32>} : memref<8x256xf32, #tpu.memory_space<vmem>>, vector<8x32xf32>,
    %cst_41 = arith.constant dense<0xFF800000> : vector<8xf32>
    %144 = vector.multi_reduction <maximumf>, %142, %cst_41 [1] : vector<8x32xf32> to vector<8xf32>
    %145 = vector.shape_cast %144 : vector<8xf32> to vector<8x1xf32>
    %146 = vector.broadcast %145 : vector<8x1xf32> to vector<8x32xf32>
    %147 = arith.cmpf oeq, %142, %146 : vector<8x32xf32>
    %148 = arith.extui %147 : vector<8x32xi1> to vector<8x32xi32>
    %149 = arith.sitofp %148 : vector<8x32xi32> to vector<8x32xf32>
    %cst_42 = arith.constant dense<0.000000e+00> : vector<8x128xf32>
    %150 = tpu.matmul %149, %1, %cst_42 {dimension_numbers = #tpu.dot_dimension_numbers<[1], [0], [0], [1], [0, 0, 1, 1], [], []>} : vector<8x32xf32>, vector<32x128xf32>, vector<8x128xf32> -> vector<8x128xf32>
    %151 = arith.addf %150, %140 : vector<8x128xf32>
    %152 = math.tanh %151 : vector<8x128xf32>
    %cst_43 = arith.constant 5.000000e-01 : f32
    %153 = vector.broadcast %cst_43 : f32 to vector<8x128xf32>
    %154 = arith.mulf %153, %152 : vector<8x128xf32>
    %cst_44 = arith.constant 5.000000e-01 : f32
    %155 = vector.broadcast %cst_44 : f32 to vector<8x128xf32>
    %156 = arith.addf %154, %155 : vector<8x128xf32>
    %157 = vector.extract_strided_slice %156 {offsets = [0, 0], sizes = [8, 32], strides = [1, 1]} : vector<8x128xf32> to vector<8x32xf32>
    %158 = vector.extract_strided_slice %156 {offsets = [0, 32], sizes = [8, 32], strides = [1, 1]} : vector<8x128xf32> to vector<8x32xf32>
    %159 = vector.extract_strided_slice %152 {offsets = [0, 64], sizes = [8, 32], strides = [1, 1]} : vector<8x128xf32> to vector<8x32xf32>
    %160 = vector.extract_strided_slice %156 {offsets = [0, 96], sizes = [8, 32], strides = [1, 1]} : vector<8x128xf32> to vector<8x32xf32>
    %161 = arith.mulf %158, %136 : vector<8x32xf32>
    %162 = arith.mulf %157, %159 : vector<8x32xf32>
    %163 = arith.addf %161, %162 : vector<8x32xf32>
    %164 = math.tanh %163 : vector<8x32xf32>
    %165 = arith.mulf %160, %164 : vector<8x32xf32>
    %cst_45 = arith.constant dense<0.000000e+00> : vector<8x160xf32>
    %166 = tpu.matmul %165, %2, %cst_45 {dimension_numbers = #tpu.dot_dimension_numbers<[1], [0], [0], [1], [0, 0, 1, 1], [], []>} : vector<8x32xf32>, vector<32x160xf32>, vector<8x160xf32> -> vector<8x160xf32>
    %167 = vector.extract_strided_slice %166 {offsets = [0, 0], sizes = [8, 128], strides = [1, 1]} : vector<8x160xf32> to vector<8x128xf32>
    %168 = vector.extract_strided_slice %166 {offsets = [0, 128], sizes = [8, 32], strides = [1, 1]} : vector<8x160xf32> to vector<8x32xf32>
    %169 = arith.addf %168, %5 : vector<8x32xf32>
    %c0_46 = arith.constant 0 : index
    %c160 = arith.constant 160 : index
    %170 = vector.load %arg6[%c0_46, %c160] : memref<8x256xf32, #tpu.memory_space<vmem>>, vector<8x32xf32>
    tpu.vector_store %arg6[%c0_46, %c160], %169 {strides = array<i32>} : memref<8x256xf32, #tpu.memory_space<vmem>>, vector<8x32xf32>,
    %cst_47 = arith.constant dense<0xFF800000> : vector<8xf32>
    %171 = vector.multi_reduction <maximumf>, %169, %cst_47 [1] : vector<8x32xf32> to vector<8xf32>
    %172 = vector.shape_cast %171 : vector<8xf32> to vector<8x1xf32>
    %173 = vector.broadcast %172 : vector<8x1xf32> to vector<8x32xf32>
    %174 = arith.cmpf oeq, %169, %173 : vector<8x32xf32>
    %175 = arith.extui %174 : vector<8x32xi1> to vector<8x32xi32>
    %176 = arith.sitofp %175 : vector<8x32xi32> to vector<8x32xf32>
    %cst_48 = arith.constant dense<0.000000e+00> : vector<8x128xf32>
    %177 = tpu.matmul %176, %1, %cst_48 {dimension_numbers = #tpu.dot_dimension_numbers<[1], [0], [0], [1], [0, 0, 1, 1], [], []>} : vector<8x32xf32>, vector<32x128xf32>, vector<8x128xf32> -> vector<8x128xf32>
    %178 = arith.addf %177, %167 : vector<8x128xf32>
    %179 = math.tanh %178 : vector<8x128xf32>
    %cst_49 = arith.constant 5.000000e-01 : f32
    %180 = vector.broadcast %cst_49 : f32 to vector<8x128xf32>
    %181 = arith.mulf %180, %179 : vector<8x128xf32>
    %cst_50 = arith.constant 5.000000e-01 : f32
    %182 = vector.broadcast %cst_50 : f32 to vector<8x128xf32>
    %183 = arith.addf %181, %182 : vector<8x128xf32>
    %184 = vector.extract_strided_slice %183 {offsets = [0, 0], sizes = [8, 32], strides = [1, 1]} : vector<8x128xf32> to vector<8x32xf32>
    %185 = vector.extract_strided_slice %183 {offsets = [0, 32], sizes = [8, 32], strides = [1, 1]} : vector<8x128xf32> to vector<8x32xf32>
    %186 = vector.extract_strided_slice %179 {offsets = [0, 64], sizes = [8, 32], strides = [1, 1]} : vector<8x128xf32> to vector<8x32xf32>
    %187 = vector.extract_strided_slice %183 {offsets = [0, 96], sizes = [8, 32], strides = [1, 1]} : vector<8x128xf32> to vector<8x32xf32>
    %188 = arith.mulf %185, %163 : vector<8x32xf32>
    %189 = arith.mulf %184, %186 : vector<8x32xf32>
    %190 = arith.addf %188, %189 : vector<8x32xf32>
    %191 = math.tanh %190 : vector<8x32xf32>
    %192 = arith.mulf %187, %191 : vector<8x32xf32>
    %cst_51 = arith.constant dense<0.000000e+00> : vector<8x160xf32>
    %193 = tpu.matmul %192, %2, %cst_51 {dimension_numbers = #tpu.dot_dimension_numbers<[1], [0], [0], [1], [0, 0, 1, 1], [], []>} : vector<8x32xf32>, vector<32x160xf32>, vector<8x160xf32> -> vector<8x160xf32>
    %194 = vector.extract_strided_slice %193 {offsets = [0, 0], sizes = [8, 128], strides = [1, 1]} : vector<8x160xf32> to vector<8x128xf32>
    %195 = vector.extract_strided_slice %193 {offsets = [0, 128], sizes = [8, 32], strides = [1, 1]} : vector<8x160xf32> to vector<8x32xf32>
    %196 = arith.addf %195, %5 : vector<8x32xf32>
    %c0_52 = arith.constant 0 : index
    %c192 = arith.constant 192 : index
    %197 = vector.load %arg6[%c0_52, %c192] : memref<8x256xf32, #tpu.memory_space<vmem>>, vector<8x32xf32>
    tpu.vector_store %arg6[%c0_52, %c192], %196 {strides = array<i32>} : memref<8x256xf32, #tpu.memory_space<vmem>>, vector<8x32xf32>,
    %cst_53 = arith.constant dense<0xFF800000> : vector<8xf32>
    %198 = vector.multi_reduction <maximumf>, %196, %cst_53 [1] : vector<8x32xf32> to vector<8xf32>
    %199 = vector.shape_cast %198 : vector<8xf32> to vector<8x1xf32>
    %200 = vector.broadcast %199 : vector<8x1xf32> to vector<8x32xf32>
    %201 = arith.cmpf oeq, %196, %200 : vector<8x32xf32>
    %202 = arith.extui %201 : vector<8x32xi1> to vector<8x32xi32>
    %203 = arith.sitofp %202 : vector<8x32xi32> to vector<8x32xf32>
    %cst_54 = arith.constant dense<0.000000e+00> : vector<8x128xf32>
    %204 = tpu.matmul %203, %1, %cst_54 {dimension_numbers = #tpu.dot_dimension_numbers<[1], [0], [0], [1], [0, 0, 1, 1], [], []>} : vector<8x32xf32>, vector<32x128xf32>, vector<8x128xf32> -> vector<8x128xf32>
    %205 = arith.addf %204, %194 : vector<8x128xf32>
    %206 = math.tanh %205 : vector<8x128xf32>
    %cst_55 = arith.constant 5.000000e-01 : f32
    %207 = vector.broadcast %cst_55 : f32 to vector<8x128xf32>
    %208 = arith.mulf %207, %206 : vector<8x128xf32>
    %cst_56 = arith.constant 5.000000e-01 : f32
    %209 = vector.broadcast %cst_56 : f32 to vector<8x128xf32>
    %210 = arith.addf %208, %209 : vector<8x128xf32>
    %211 = vector.extract_strided_slice %210 {offsets = [0, 0], sizes = [8, 32], strides = [1, 1]} : vector<8x128xf32> to vector<8x32xf32>
    %212 = vector.extract_strided_slice %210 {offsets = [0, 32], sizes = [8, 32], strides = [1, 1]} : vector<8x128xf32> to vector<8x32xf32>
    %213 = vector.extract_strided_slice %206 {offsets = [0, 64], sizes = [8, 32], strides = [1, 1]} : vector<8x128xf32> to vector<8x32xf32>
    %214 = vector.extract_strided_slice %210 {offsets = [0, 96], sizes = [8, 32], strides = [1, 1]} : vector<8x128xf32> to vector<8x32xf32>
    %215 = arith.mulf %212, %190 : vector<8x32xf32>
    %216 = arith.mulf %211, %213 : vector<8x32xf32>
    %217 = arith.addf %215, %216 : vector<8x32xf32>
    %218 = math.tanh %217 : vector<8x32xf32>
    %219 = arith.mulf %214, %218 : vector<8x32xf32>
    %cst_57 = arith.constant dense<0.000000e+00> : vector<8x160xf32>
    %220 = tpu.matmul %219, %2, %cst_57 {dimension_numbers = #tpu.dot_dimension_numbers<[1], [0], [0], [1], [0, 0, 1, 1], [], []>} : vector<8x32xf32>, vector<32x160xf32>, vector<8x160xf32> -> vector<8x160xf32>
    %221 = vector.extract_strided_slice %220 {offsets = [0, 128], sizes = [8, 32], strides = [1, 1]} : vector<8x160xf32> to vector<8x32xf32>
    %222 = arith.addf %221, %5 : vector<8x32xf32>
    %c0_58 = arith.constant 0 : index
    %c224 = arith.constant 224 : index
    %223 = vector.load %arg6[%c0_58, %c224] : memref<8x256xf32, #tpu.memory_space<vmem>>, vector<8x32xf32>
    tpu.vector_store %arg6[%c0_58, %c224], %222 {strides = array<i32>} : memref<8x256xf32, #tpu.memory_space<vmem>>, vector<8x32xf32>,
    return
  }
}

</mosaic_0001>

<bundles_post_ra>
// kernel: tpu_custom_call.1
= control target key start
LH: loop header
LB: loop body
LE: loop exit
PB: predicated region body
PF: predicated region fallthrough
CT: control target
= control target key end

     0   :  { %11 = vsyncpa [#allocation3], 0  ;;  %s2266_s0 = inlined_call_operand.vmem [shape: s32[8,1], index: 0, kind: input, shape index: {}]   ;;  %s2267_s1 = inlined_call_operand.hbm [shape: f32[32,128], index: 1, kind: input, shape index: {}]   ;;  %s2268_s2 = inlined_call_operand.hbm [shape: f32[32,160], index: 2, kind: input, shape index: {}]   ;;  %s2269_s3 = inlined_call_operand.hbm [shape: f32[1,32], index: 3, kind: input, shape index: {}]   ;;  %s2270_s4 = inlined_call_operand.vmem [shape: f32[8,32], index: 4, kind: input, shape index: {}]   ;;  %s2271_s5 = inlined_call_operand.vmem [shape: f32[8,32], index: 5, kind: input, shape index: {}]   ;;  %s2272_s6 = inlined_call_operand.hbm [shape: f32[8,256], index: 6, kind: output, shape index: {}]  }
   0x1   :  { %12 = vsyncpa [#allocation6], 0 }
   0x2   :  { %13 = vsyncpa [#allocation4], 0  ;;  %s1910_s21 = smov [#allocation5]  }
   0x3   :  { %s33_s22 = sshll.u32 %s1910_s21, 4  ;;  %s34_s22 = int_to_ptr.vmem [resolvable:$true] %s33_s22 }
   0x4   :  { %s1832_s23 = scalar_lea.vmem %s34_s22, 1024  ;;  %p1837_p1 = scmp.lt.s32.totalorder %s34_s22, %s34_s22 }
   0x5   :  { %p1833_p0 = scmp.ne.s32.totalorder %s34_s22, %s1832_s23  ;;  %p1838_p2 = scmp.lt.s32.totalorder %s1832_s23, %s1832_s23 }
   0x7   :  { %p1839_p3 = por %p1838_p2, %p1837_p1 }
   0x9   :  { %p1840_p4 = pnand %p1839_p3, %p1833_p0 }
   0xb   :  { %1843 = shalt.err (!%p1840_p4)
}
   0xc   :  { %s1911_s24 = smov 256   ;;  %s1912_s25 = smov 16  }
   0xd   :  { %39 = dma.hbm_to_vmem [thread:$0]  %s2268_s2, 1024, %s34_s22, [#allocation6], %s1911_s24, %s1911_s24, %s1912_s25  }
   0xe   :  { %s1913_s28 = smov [#allocation2]  }
   0xf   :  { %s21_s29 = sshll.u32 %s1913_s28, 4  ;;  %s22_s29 = int_to_ptr.vmem [resolvable:$true] %s21_s29 }
  0x10   :  { %s1852_s30 = scalar_lea.vmem %s22_s29, 512  ;;  %p1857_p6 = scmp.lt.s32.totalorder %s22_s29, %s22_s29 }
  0x11   :  { %p1853_p5 = scmp.ne.s32.totalorder %s22_s29, %s1852_s30  ;;  %p1858_p7 = scmp.lt.s32.totalorder %s1852_s30, %s1852_s30 }
  0x13   :  { %p1859_p8 = por %p1858_p7, %p1857_p6 }
  0x15   :  { %p1860_p9 = pnand %p1859_p8, %p1853_p5 }
  0x17   :  { %1863 = shalt.err (!%p1860_p9)
}
  0x18   :  { %s1914_s7 = smov 128   ;;  %s1915_s8 = smov 8  }
  0x19   :  { %27 = dma.hbm_to_vmem [thread:$0]  %s2267_s1, 512, %s22_s29, [#allocation3], %s1914_s7, %s1914_s7, %s1915_s8  }
  0x1a   :  { %s1916_s11 = smov [#allocation7]  }
  0x1b   :  { %s46_s12 = sshll.u32 %s1916_s11, 4  ;;  %s47_s12 = int_to_ptr.vmem [resolvable:$true] %s46_s12 }
  0x1c   :  { %s1872_s2 = scalar_lea.vmem %s47_s12, 16  ;;  %s1876_s13 = scalar_lea.vmem %s47_s12, 32 }
  0x1d   :  { %p1873_p10 = scmp.ne.s32.totalorder %s47_s12, %s1872_s2  ;;  %p1877_p11 = scmp.lt.s32.totalorder %s47_s12, %s47_s12 }
  0x1e   :  { %p1878_p12 = scmp.lt.s32.totalorder %s1876_s13, %s1872_s2 }
  0x20   :  { %p1879_p13 = por %p1878_p12, %p1877_p11 }
  0x22   :  { %p1880_p0 = pnand %p1879_p13, %p1873_p10 }
  0x24   :  { %1883 = shalt.err (!%p1880_p0)
}
  0x25   :  { %49 = dma.hbm_to_vmem [thread:$0]  %s2269_s3, 16, %s47_s12, [#allocation6]  }
  0x26   :  { %1904 = dma.done.wait [#allocation3], 512  }
  0x27   :  { %1905 = vsyncadd [#allocation3], 4294966784 }
  0x28   :  { %1906 = dma.done.wait [#allocation6], 1040  }
  0x29   :  { %1907 = vsyncadd [#allocation6], 4294966256  ;;  %v1917_v0 = vmov 0   ;;  %v1918_v1 = vmov 0.0   ;;  %vm1919_vm0 = vmmov 0   ;;  %v84_v2 = vld [vmem:[%s2266_s0] sm:$0xff]  ;;  %v63_v17 = vlaneseq }
  0x2a   :  { %1791 = vset.pattern.permute.xlu0 %v1917_v0  ;;  %1689 = vmatprep.subr.mxu1 %v1918_v1  ;;  %v1975_v3 = vld [vmem:[#allocation5 + $0x38] sm:$0xff]  ;;  %v1977_v4 = vld [vmem:[#allocation5 + $0x30] sm:$0xff]  ;;  %v1980_v5 = vld [vmem:[#allocation5 + $0x28] sm:$0xff]  ;;  %vm93_vm1 = vcmask 261120   ;;  %s1920_s19 = smov 32   ;;  %vm522_vm10 = vcmask 523520  }
  0x2b   :  { %161 = vmatprep.mubr.f32.mxu0 %v1918_v1  ;;  %1697 = vmatprep.mubr.msk.f32.mxu1 %vm1919_vm0, %v1918_v1  ;;  %v1982_v6 = vld [vmem:[#allocation5 + $0x20] sm:$0xff]  ;;  %v1984_v7 = vld [vmem:[#allocation2 + $0x18] sm:$0xff]  ;;  %v1990_v9 = vld [vmem:[#allocation2 + $0x10] sm:$0xff]  ;;  %v64_v18 = vand.u32 127, %v63_v17  ;;  %vm704_vm11 = vcmask 785920   ;;  %vm886_vm12 = vcmask 1048320  }
  0x2c   :  { %86 = vperm.xlu0 %1791, %v84_v2   ;;  %121 = vmatprep.subr.mxu0 %v1975_v3  ;;  %v1988_v8 = vld [vmem:[#allocation5 + $0x18] sm:$0xff]  ;;  %v1994_v10 = vld [vmem:[#allocation5 + $0x10] sm:$0xff]  ;;  %v1996_v11 = vld [vmem:[#allocation2 + $0x8] sm:$0xff]  ;;  %s1923_s20 = smov [#allocation8]  }
  0x2d   :  { %122 = vmatpush1.msra.mxu0 %v1977_v4  ;;  %1690 = vmatpush3.msra.mxu1 %v1984_v7  ;;  %v2000_v12 = vld [vmem:[#allocation5 + $0x8] sm:$0xff]  ;;  %v2004_v13 = vld [vmem:[#allocation5] sm:$0xff]  ;;  %s1613_s21 = sshll.u32 %s1923_s20, 4  ;;  %s1614_s21 = int_to_ptr.vmem [resolvable:$true] %s1613_s21 }
  0x2e   :  { %123 = vmatprep.subr.mxu0 %v1980_v5  ;;  %1691 = vmatprep.subr.mxu1 %v1918_v1  ;;  %v2006_v14 = vld [vmem:[#allocation2] sm:$0xff]  ;;  %s1884_s22 = scalar_lea.vmem %s1614_s21, 256  ;;  %p1889_p2 = scmp.lt.s32.totalorder %s1614_s21, %s1614_s21 }
  0x2f   :  { %124 = vmatpush1.msra.mxu0 %v1982_v6  ;;  %1692 = vmatpush3.msra.mxu1 %v1990_v9  ;;  %v92_v15 = vld [vmem:[%s2270_s4] sm:$0xff]  ;;  %s1921_s4 = smov 64   ;;  %p1885_p1 = scmp.ne.s32.totalorder %s1614_s21, %s1884_s22 }
  0x30   :  { %125 = vmatprep.subr.mxu0 %v1988_v8  ;;  %1693 = vmatprep.subr.mxu1 %v1918_v1  ;;  %v91_v16 = vld [vmem:[%s2271_s5] sm:$0xff]  ;;  %s1922_s5 = smov 96   ;;  %p1890_p3 = scmp.lt.s32.totalorder %s1884_s22, %s1884_s22 }
  0x31   :  { %126 = vmatpush1.msra.mxu0 %v1994_v10  ;;  %1694 = vmatpush3.msra.mxu1 %v1996_v11  ;;  %v2059_v40 = vld [vmem:[#allocation7] ss:$0 sm:$0xff] }
  0x32   :  { %127 = vmatprep.subr.mxu0 %v2000_v12  ;;  %1695 = vmatprep.subr.mxu1 %v1918_v1  ;;  %p1891_p4 = por %p1890_p3, %p1889_p2 }
  0x33   :  { %128 = vmatpush1.msra.mxu0 %v2004_v13  ;;  %1696 = vmatpush3.msra.mxu1 %v2006_v14 }
  0x34   :  { %1625 = vmatmul.mubr.msk.f32.vlgmr.msra.gmra.mxu0 %vm93_vm1, %v92_v15  ;;  %244 = vrot.lane.b32.xlu1 %v91_v16, %s1920_s19  ;;  %p1892_p5 = pnand %p1891_p4, %p1885_p1 }
  0x35   :  { %293 = vmatprep.subr.mxu0 %v1975_v3  ;;  %333 = vmatprep.mubr.f32.mxu0 %v1918_v1 }
  0x36   :  { %294 = vmatpush1.msra.mxu0 %v1977_v4  ;;  %1700 = vmatprep.subr.mxu1 %v1918_v1 }
  0x37   :  { %295 = vmatprep.subr.mxu0 %v1980_v5 }
  0x38   :  { %296 = vmatpush1.msra.mxu0 %v1982_v6 }
  0x39   :  { %297 = vmatprep.subr.mxu0 %v1988_v8 }
  0x3a   :  { %298 = vmatpush1.msra.mxu0 %v1994_v10 }
  0x3b   :  { %299 = vmatprep.subr.mxu0 %v2000_v12 }
  0x3c   :  { %300 = vmatpush1.msra.mxu0 %v2004_v13 }
  0x3d   :  { %470 = vmatprep.subr.mxu0 %v1975_v3 }
  0xa6   :  { %v245_v31 = vpop.permute.xlu1 %244 }
  0xa7   :  { %v87_v19 = vpop.permute.xlu0 %86 }
  0xa8   :  { %vm88_vm2 = vcmp.eq.s32.totalorder %v64_v18, %v87_v19 }
  0xa9   :  { %v1624_v20 = vsel %vm88_vm2, 1.0, %v1918_v1 }
  0xaa   :  { %1698 = vmatmul.mubr.msk.f32.vlgmr.msra.gmra.mxu1 %vm93_vm1, %v1624_v20 }
  0xab   :  { %1701 = vmatpush3.msra.mxu1 %v1984_v7  ;;  %1708 = vmatprep.mubr.msk.f32.mxu1 %vm1919_vm0, %v1918_v1 }
  0xac   :  { %1702 = vmatprep.subr.mxu1 %v1918_v1 }
  0xad   :  { %1703 = vmatpush3.msra.mxu1 %v1990_v9 }
  0xae   :  { %1704 = vmatprep.subr.mxu1 %v1918_v1 }
  0xaf   :  { %1705 = vmatpush3.msra.mxu1 %v1996_v11 }
  0xb0   :  { %1706 = vmatprep.subr.mxu1 %v1918_v1 }
  0xb1   :  { %1707 = vmatpush3.msra.mxu1 %v2006_v14 }
  0xb2   :  { %1711 = vmatprep.subr.mxu1 %v1918_v1 }
  0xf4   :  { %v163_v21 = vpop.f32.mrf.mxu0 }
  0xf6   :  { %v165_v22 = vpop.f32.mrf.mxu0 }
 0x16a   :  { %v236_v23 = vpop.f32.mrf.mxu1 }
 0x16b   :  { %v237_v24 = vadd.f32 %v236_v23, %v163_v21 }
 0x16c   :  { %v1699_v25 = vpop.f32.mrf.mxu1 }
 0x16d   :  { %1792 = vtanh.f32 %v237_v24 }
 0x17a   :  { %v1793_v26 = vpop.eup %1792 }
 0x17b   :  { %249 = vrot.lane.b32.xlu0 %v1793_v26, %s1921_s4  ;;  %v241_v27 = vmul.f32 0.5, %v1793_v26 }
 0x17d   :  { %v242_v28 = vadd.f32 0.5, %v241_v27 }
 0x17f   :  { %v247_v32 = vmul.f32 %v245_v31, %v242_v28 }
 0x1ed   :  { %v250_v29 = vpop.permute.xlu0 %249 }
 0x1ee   :  { %v252_v30 = vmul.f32 %v250_v29, %v242_v28 }
 0x1f0   :  { %254 = vrot.lane.b32.xlu1 %v252_v30, %s1920_s19 }
 0x262   :  { %v255_v33 = vpop.permute.xlu1 %254 }
 0x263   :  { %v257_v34 = vadd.f32 %v255_v33, %v247_v32 }
 0x265   :  { %1794 = vtanh.f32 %v257_v34 }
 0x272   :  { %v1795_v35 = vpop.eup %1794 }
 0x273   :  { %260 = vrot.lane.b32.xlu0 %v1795_v35, %s1921_s4 }
 0x2e5   :  { %v261_v36 = vpop.permute.xlu0 %260 }
 0x2e6   :  { %v263_v37 = vmul.f32 %v261_v36, %v242_v28 }
 0x2e8   :  { %265 = vrot.lane.b32.xlu1 %v263_v37, %s1920_s19 }
 0x35a   :  { %v266_v38 = vpop.permute.xlu1 %265 }
 0x35b   :  { %1627 = vmatmul.mubr.msk.f32.vlgmr.msra.gmra.mxu0 %vm93_vm1, %v266_v38 }
 0x35c   :  { %471 = vmatpush1.msra.mxu0 %v1977_v4  ;;  %510 = vmatprep.mubr.f32.mxu0 %v1918_v1 }
 0x35d   :  { %472 = vmatprep.subr.mxu0 %v1980_v5 }
 0x35e   :  { %473 = vmatpush1.msra.mxu0 %v1982_v6 }
 0x35f   :  { %474 = vmatprep.subr.mxu0 %v1988_v8 }
 0x360   :  { %475 = vmatpush1.msra.mxu0 %v1994_v10 }
 0x361   :  { %476 = vmatprep.subr.mxu0 %v2000_v12 }
 0x362   :  { %477 = vmatpush1.msra.mxu0 %v2004_v13 }
 0x363   :  { %652 = vmatprep.subr.mxu0 %v1975_v3 }
 0x41b   :  { %v335_v39 = vpop.f32.mrf.mxu0 }
 0x41d   :  { %v337_v41 = vpop.f32.mrf.mxu0 }
 0x41e   :  { %v340_v42 = vadd.f32 %v2059_v40, %v337_v41 }
 0x420   :  { %341 = vst.msk [vmem:[#allocation8] sm:$0xff] %vm93_vm1, %v340_v42  ;;  %v342_v43 = vsel %vm93_vm1, %v340_v42, -inf }
 0x421   :  { %343 = vmax.xlane.f32.xlu0 %v342_v43 }
 0x4aa   :  { %v344_v44 = vpop.xlane.xlu0 %343 }
 0x4ab   :  { %vm345_vm3 = vcmp.eq.f32.partialorder %v340_v42, %v344_v44 }
 0x4ac   :  { %v1628_v45 = vsel %vm345_vm3, 1.0, %v1918_v1 }
 0x4ad   :  { %1709 = vmatmul.mubr.msk.f32.vlgmr.msra.gmra.mxu1 %vm93_vm1, %v1628_v45 }
 0x4ae   :  { %1712 = vmatpush3.msra.mxu1 %v1984_v7  ;;  %1719 = vmatprep.mubr.msk.f32.mxu1 %vm1919_vm0, %v1918_v1 }
 0x4af   :  { %1713 = vmatprep.subr.mxu1 %v1918_v1 }
 0x4b0   :  { %1714 = vmatpush3.msra.mxu1 %v1990_v9 }
 0x4b1   :  { %1715 = vmatprep.subr.mxu1 %v1918_v1 }
 0x4b2   :  { %1716 = vmatpush3.msra.mxu1 %v1996_v11 }
 0x4b3   :  { %1717 = vmatprep.subr.mxu1 %v1918_v1 }
 0x4b4   :  { %1718 = vmatpush3.msra.mxu1 %v2006_v14 }
 0x4b5   :  { %1722 = vmatprep.subr.mxu1 %v1918_v1 }
 0x56d   :  { %v417_v46 = vpop.f32.mrf.mxu1 }
 0x56e   :  { %v418_v47 = vadd.f32 %v417_v46, %v335_v39 }
 0x56f   :  { %v1710_v48 = vpop.f32.mrf.mxu1 }
 0x570   :  { %1796 = vtanh.f32 %v418_v47 }
 0x57d   :  { %v1797_v49 = vpop.eup %1796 }
 0x57e   :  { %426 = vrot.lane.b32.xlu1 %v1797_v49, %s1921_s4  ;;  %v422_v50 = vmul.f32 0.5, %v1797_v49 }
 0x580   :  { %v423_v51 = vadd.f32 0.5, %v422_v50 }
 0x582   :  { %v424_v54 = vmul.f32 %v423_v51, %v257_v34 }
 0x5f0   :  { %v427_v52 = vpop.permute.xlu1 %426 }
 0x5f1   :  { %v429_v53 = vmul.f32 %v427_v52, %v423_v51 }
 0x5f3   :  { %431 = vrot.lane.b32.xlu1 %v429_v53, %s1920_s19 }
 0x665   :  { %v432_v55 = vpop.permute.xlu1 %431 }
 0x666   :  { %v434_v56 = vadd.f32 %v432_v55, %v424_v54 }
 0x668   :  { %1798 = vtanh.f32 %v434_v56 }
 0x675   :  { %v1799_v57 = vpop.eup %1798 }
 0x676   :  { %437 = vrot.lane.b32.xlu1 %v1799_v57, %s1921_s4 }
 0x6e8   :  { %v438_v58 = vpop.permute.xlu1 %437 }
 0x6e9   :  { %v440_v59 = vmul.f32 %v438_v58, %v423_v51 }
 0x6eb   :  { %442 = vrot.lane.b32.xlu1 %v440_v59, %s1920_s19 }
 0x75d   :  { %v443_v60 = vpop.permute.xlu1 %442 }
 0x75e   :  { %1630 = vmatmul.mubr.msk.f32.vlgmr.msra.gmra.mxu0 %vm93_vm1, %v443_v60 }
 0x75f   :  { %653 = vmatpush1.msra.mxu0 %v1977_v4  ;;  %692 = vmatprep.mubr.f32.mxu0 %v1918_v1 }
 0x760   :  { %654 = vmatprep.subr.mxu0 %v1980_v5 }
 0x761   :  { %655 = vmatpush1.msra.mxu0 %v1982_v6 }
 0x762   :  { %656 = vmatprep.subr.mxu0 %v1988_v8 }
 0x763   :  { %657 = vmatpush1.msra.mxu0 %v1994_v10 }
 0x764   :  { %658 = vmatprep.subr.mxu0 %v2000_v12 }
 0x765   :  { %659 = vmatpush1.msra.mxu0 %v2004_v13 }
 0x766   :  { %834 = vmatprep.subr.mxu0 %v1975_v3 }
 0x81e   :  { %v512_v61 = vpop.f32.mrf.mxu0 }
 0x820   :  { %v514_v62 = vpop.f32.mrf.mxu0 }
 0x821   :  { %v2091_v63 = vadd.f32 %v2059_v40, %v514_v62 }
 0x823   :  { %v524_v0 = vsel %vm93_vm1, %v2091_v63, -inf }
 0x824   :  { %525 = vmax.xlane.f32.xlu1 %v524_v0 }
 0x8ad   :  { %v526_v2 = vpop.xlane.xlu1 %525 }
 0x8ae   :  { %vm527_vm4 = vcmp.eq.f32.partialorder %v2091_v63, %v526_v2 }
 0x8af   :  { %v1631_v15 = vsel %vm527_vm4, 1.0, %v1918_v1 }
 0x8b0   :  { %1720 = vmatmul.mubr.msk.f32.vlgmr.msra.gmra.mxu1 %vm93_vm1, %v1631_v15 }
 0x8b1   :  { %1723 = vmatpush3.msra.mxu1 %v1984_v7  ;;  %1730 = vmatprep.mubr.msk.f32.mxu1 %vm1919_vm0, %v1918_v1 }
 0x8b2   :  { %1724 = vmatprep.subr.mxu1 %v1918_v1 }
 0x8b3   :  { %1725 = vmatpush3.msra.mxu1 %v1990_v9 }
 0x8b4   :  { %1726 = vmatprep.subr.mxu1 %v1918_v1 }
 0x8b5   :  { %1727 = vmatpush3.msra.mxu1 %v1996_v11 }
 0x8b6   :  { %1728 = vmatprep.subr.mxu1 %v1918_v1 }
 0x8b7   :  { %1729 = vmatpush3.msra.mxu1 %v2006_v14 }
 0x8b8   :  { %1733 = vmatprep.subr.mxu1 %v1918_v1 }
 0x970   :  { %v599_v16 = vpop.f32.mrf.mxu1 }
 0x971   :  { %v600_v17 = vadd.f32 %v599_v16, %v512_v61 }
 0x972   :  { %v1721_v18 = vpop.f32.mrf.mxu1 }
 0x973   :  { %1800 = vtanh.f32 %v600_v17 }
 0x980   :  { %v1801_v19 = vpop.eup %1800 }
 0x981   :  { %608 = vrot.lane.b32.xlu0 %v1801_v19, %s1921_s4  ;;  %v604_v20 = vmul.f32 0.5, %v1801_v19 }
 0x983   :  { %v605_v21 = vadd.f32 0.5, %v604_v20 }
 0x985   :  { %v606_v24 = vmul.f32 %v605_v21, %v434_v56 }
 0x9f3   :  { %v609_v22 = vpop.permute.xlu0 %608 }
 0x9f4   :  { %v611_v23 = vmul.f32 %v609_v22, %v605_v21 }
 0x9f6   :  { %613 = vrot.lane.b32.xlu1 %v611_v23, %s1920_s19 }
 0xa68   :  { %v614_v25 = vpop.permute.xlu1 %613 }
 0xa69   :  { %v616_v26 = vadd.f32 %v614_v25, %v606_v24 }
 0xa6b   :  { %1802 = vtanh.f32 %v616_v26 }
 0xa78   :  { %v1803_v27 = vpop.eup %1802 }
 0xa79   :  { %619 = vrot.lane.b32.xlu0 %v1803_v27, %s1921_s4 }
 0xaeb   :  { %v620_v28 = vpop.permute.xlu0 %619 }
 0xaec   :  { %v622_v29 = vmul.f32 %v620_v28, %v605_v21 }
 0xaee   :  { %624 = vrot.lane.b32.xlu0 %v622_v29, %s1920_s19 }
 0xb60   :  { %v625_v30 = vpop.permute.xlu0 %624 }
 0xb61   :  { %1633 = vmatmul.mubr.msk.f32.vlgmr.msra.gmra.mxu0 %vm93_vm1, %v625_v30 }
 0xb62   :  { %835 = vmatpush1.msra.mxu0 %v1977_v4  ;;  %874 = vmatprep.mubr.f32.mxu0 %v1918_v1 }
 0xb63   :  { %836 = vmatprep.subr.mxu0 %v1980_v5 }
 0xb64   :  { %837 = vmatpush1.msra.mxu0 %v1982_v6 }
 0xb65   :  { %838 = vmatprep.subr.mxu0 %v1988_v8 }
 0xb66   :  { %839 = vmatpush1.msra.mxu0 %v1994_v10 }
 0xb67   :  { %840 = vmatprep.subr.mxu0 %v2000_v12 }
 0xb68   :  { %841 = vmatpush1.msra.mxu0 %v2004_v13 }
 0xb69   :  { %1016 = vmatprep.subr.mxu0 %v1975_v3 }
 0xc21   :  { %v694_v31 = vpop.f32.mrf.mxu0 }
 0xc23   :  { %v696_v32 = vpop.f32.mrf.mxu0 }
 0xc24   :  { %v2123_v33 = vadd.f32 %v2059_v40, %v696_v32 }
 0xc26   :  { %v706_v34 = vsel %vm93_vm1, %v2123_v33, -inf }
 0xc27   :  { %707 = vmax.xlane.f32.xlu0 %v706_v34 }
 0xcb0   :  { %v708_v35 = vpop.xlane.xlu0 %707 }
 0xcb1   :  { %vm709_vm5 = vcmp.eq.f32.partialorder %v2123_v33, %v708_v35 }
 0xcb2   :  { %v1634_v36 = vsel %vm709_vm5, 1.0, %v1918_v1 }
 0xcb3   :  { %1731 = vmatmul.mubr.msk.f32.vlgmr.msra.gmra.mxu1 %vm93_vm1, %v1634_v36 }
 0xcb4   :  { %1734 = vmatpush3.msra.mxu1 %v1984_v7  ;;  %1741 = vmatprep.mubr.msk.f32.mxu1 %vm1919_vm0, %v1918_v1 }
 0xcb5   :  { %1735 = vmatprep.subr.mxu1 %v1918_v1 }
 0xcb6   :  { %1736 = vmatpush3.msra.mxu1 %v1990_v9 }
 0xcb7   :  { %1737 = vmatprep.subr.mxu1 %v1918_v1 }
 0xcb8   :  { %1738 = vmatpush3.msra.mxu1 %v1996_v11 }
 0xcb9   :  { %1739 = vmatprep.subr.mxu1 %v1918_v1 }
 0xcba   :  { %1740 = vmatpush3.msra.mxu1 %v2006_v14 }
 0xcbb   :  { %1744 = vmatprep.subr.mxu1 %v1918_v1 }
 0xd73   :  { %v781_v37 = vpop.f32.mrf.mxu1 }
 0xd74   :  { %v782_v38 = vadd.f32 %v781_v37, %v694_v31 }
 0xd75   :  { %v1732_v39 = vpop.f32.mrf.mxu1 }
 0xd76   :  { %1804 = vtanh.f32 %v782_v38 }
 0xd83   :  { %v1805_v41 = vpop.eup %1804 }
 0xd84   :  { %790 = vrot.lane.b32.xlu1 %v1805_v41, %s1921_s4  ;;  %v786_v42 = vmul.f32 0.5, %v1805_v41 }
 0xd86   :  { %v787_v43 = vadd.f32 0.5, %v786_v42 }
 0xd88   :  { %v788_v46 = vmul.f32 %v787_v43, %v616_v26 }
 0xdf6   :  { %v791_v44 = vpop.permute.xlu1 %790 }
 0xdf7   :  { %v793_v45 = vmul.f32 %v791_v44, %v787_v43 }
 0xdf9   :  { %795 = vrot.lane.b32.xlu1 %v793_v45, %s1920_s19 }
 0xe6b   :  { %v796_v47 = vpop.permute.xlu1 %795 }
 0xe6c   :  { %v798_v48 = vadd.f32 %v796_v47, %v788_v46 }
 0xe6e   :  { %1806 = vtanh.f32 %v798_v48 }
 0xe7b   :  { %v1807_v49 = vpop.eup %1806 }
 0xe7c   :  { %801 = vrot.lane.b32.xlu1 %v1807_v49, %s1921_s4 }
 0xeee   :  { %v802_v50 = vpop.permute.xlu1 %801 }
 0xeef   :  { %v804_v51 = vmul.f32 %v802_v50, %v787_v43 }
 0xef1   :  { %806 = vrot.lane.b32.xlu1 %v804_v51, %s1920_s19 }
 0xf63   :  { %v807_v52 = vpop.permute.xlu1 %806 }
 0xf64   :  { %1636 = vmatmul.mubr.msk.f32.vlgmr.msra.gmra.mxu0 %vm93_vm1, %v807_v52 }
 0xf65   :  { %1017 = vmatpush1.msra.mxu0 %v1977_v4  ;;  %1056 = vmatprep.mubr.f32.mxu0 %v1918_v1 }
 0xf66   :  { %1018 = vmatprep.subr.mxu0 %v1980_v5 }
 0xf67   :  { %1019 = vmatpush1.msra.mxu0 %v1982_v6 }
 0xf68   :  { %1020 = vmatprep.subr.mxu0 %v1988_v8 }
 0xf69   :  { %1021 = vmatpush1.msra.mxu0 %v1994_v10 }
 0xf6a   :  { %1022 = vmatprep.subr.mxu0 %v2000_v12 }
 0xf6b   :  { %1023 = vmatpush1.msra.mxu0 %v2004_v13 }
 0xf6c   :  { %1193 = vmatprep.subr.mxu0 %v1975_v3 }
0x1024   :  { %v876_v53 = vpop.f32.mrf.mxu0 }
0x1026   :  { %v878_v54 = vpop.f32.mrf.mxu0 }
0x1027   :  { %v2155_v55 = vadd.f32 %v2059_v40, %v878_v54 }
0x1029   :  { %v888_v56 = vsel %vm93_vm1, %v2155_v55, -inf }
0x102a   :  { %889 = vmax.xlane.f32.xlu1 %v888_v56 }
0x10b3   :  { %v890_v57 = vpop.xlane.xlu1 %889 }
0x10b4   :  { %vm891_vm6 = vcmp.eq.f32.partialorder %v2155_v55, %v890_v57 }
0x10b5   :  { %v1637_v58 = vsel %vm891_vm6, 1.0, %v1918_v1 }
0x10b6   :  { %1742 = vmatmul.mubr.msk.f32.vlgmr.msra.gmra.mxu1 %vm93_vm1, %v1637_v58 }
0x10b7   :  { %1745 = vmatpush3.msra.mxu1 %v1984_v7  ;;  %1752 = vmatprep.mubr.msk.f32.mxu1 %vm1919_vm0, %v1918_v1 }
0x10b8   :  { %1746 = vmatprep.subr.mxu1 %v1918_v1 }
0x10b9   :  { %1747 = vmatpush3.msra.mxu1 %v1990_v9 }
0x10ba   :  { %1748 = vmatprep.subr.mxu1 %v1918_v1 }
0x10bb   :  { %1749 = vmatpush3.msra.mxu1 %v1996_v11 }
0x10bc   :  { %1750 = vmatprep.subr.mxu1 %v1918_v1 }
0x10bd   :  { %1751 = vmatpush3.msra.mxu1 %v2006_v14 }
0x10be   :  { %1755 = vmatprep.subr.mxu1 %v1918_v1 }
0x1176   :  { %v963_v59 = vpop.f32.mrf.mxu1 }
0x1177   :  { %v964_v60 = vadd.f32 %v963_v59, %v876_v53 }
0x1178   :  { %v1743_v61 = vpop.f32.mrf.mxu1 }
0x1179   :  { %1808 = vtanh.f32 %v964_v60 }
0x1186   :  { %v1809_v62 = vpop.eup %1808 }
0x1187   :  { %972 = vrot.lane.b32.xlu0 %v1809_v62, %s1921_s4  ;;  %v968_v0 = vmul.f32 0.5, %v1809_v62 }
0x1189   :  { %v969_v2 = vadd.f32 0.5, %v968_v0 }
0x118b   :  { %v970_v17 = vmul.f32 %v969_v2, %v798_v48 }
0x11f9   :  { %v973_v15 = vpop.permute.xlu0 %972 }
0x11fa   :  { %v975_v16 = vmul.f32 %v973_v15, %v969_v2 }
0x11fc   :  { %977 = vrot.lane.b32.xlu0 %v975_v16, %s1920_s19 }
0x126e   :  { %v978_v18 = vpop.permute.xlu0 %977 }
0x126f   :  { %v980_v19 = vadd.f32 %v978_v18, %v970_v17 }
0x1271   :  { %1810 = vtanh.f32 %v980_v19 }
0x127e   :  { %v1811_v20 = vpop.eup %1810 }
0x127f   :  { %983 = vrot.lane.b32.xlu0 %v1811_v20, %s1921_s4 }
0x12f1   :  { %v984_v21 = vpop.permute.xlu0 %983 }
0x12f2   :  { %v986_v22 = vmul.f32 %v984_v21, %v969_v2 }
0x12f4   :  { %988 = vrot.lane.b32.xlu1 %v986_v22, %s1920_s19 }
0x1366   :  { %v989_v23 = vpop.permute.xlu1 %988 }
0x1367   :  { %1639 = vmatmul.mubr.msk.f32.vlgmr.msra.gmra.mxu0 %vm93_vm1, %v989_v23 }
0x1368   :  { %1194 = vmatpush1.msra.mxu0 %v1977_v4  ;;  %1233 = vmatprep.mubr.f32.mxu0 %v1918_v1 }
0x1369   :  { %1195 = vmatprep.subr.mxu0 %v1980_v5 }
0x136a   :  { %1196 = vmatpush1.msra.mxu0 %v1982_v6 }
0x136b   :  { %1197 = vmatprep.subr.mxu0 %v1988_v8 }
0x136c   :  { %1198 = vmatpush1.msra.mxu0 %v1994_v10 }
0x136d   :  { %1199 = vmatprep.subr.mxu0 %v2000_v12 }
0x136e   :  { %1200 = vmatpush1.msra.mxu0 %v2004_v13 }
0x136f   :  { %1374 = vmatprep.subr.mxu0 %v1975_v3 }
0x1427   :  { %v1058_v24 = vpop.f32.mrf.mxu0 }
0x1429   :  { %v1060_v25 = vpop.f32.mrf.mxu0 }
0x142a   :  { %v1063_v26 = vadd.f32 %v2059_v40, %v1060_v25 }
0x142c   :  { %1064 = vst.msk [vmem:[#allocation8 + $0x8] sm:$0xff] %vm93_vm1, %v1063_v26  ;;  %v1065_v27 = vsel %vm93_vm1, %v1063_v26, -inf }
0x142d   :  { %1066 = vmax.xlane.f32.xlu0 %v1065_v27 }
0x14b6   :  { %v1067_v28 = vpop.xlane.xlu0 %1066 }
0x14b7   :  { %vm1068_vm7 = vcmp.eq.f32.partialorder %v1063_v26, %v1067_v28 }
0x14b8   :  { %v1640_v29 = vsel %vm1068_vm7, 1.0, %v1918_v1 }
0x14b9   :  { %1753 = vmatmul.mubr.msk.f32.vlgmr.msra.gmra.mxu1 %vm93_vm1, %v1640_v29 }
0x14ba   :  { %1756 = vmatpush3.msra.mxu1 %v1984_v7  ;;  %1763 = vmatprep.mubr.msk.f32.mxu1 %vm1919_vm0, %v1918_v1 }
0x14bb   :  { %1757 = vmatprep.subr.mxu1 %v1918_v1 }
0x14bc   :  { %1758 = vmatpush3.msra.mxu1 %v1990_v9 }
0x14bd   :  { %1759 = vmatprep.subr.mxu1 %v1918_v1 }
0x14be   :  { %1760 = vmatpush3.msra.mxu1 %v1996_v11 }
0x14bf   :  { %1761 = vmatprep.subr.mxu1 %v1918_v1 }
0x14c0   :  { %1762 = vmatpush3.msra.mxu1 %v2006_v14 }
0x14c1   :  { %1766 = vmatprep.subr.mxu1 %v1918_v1 }
0x1579   :  { %v1140_v30 = vpop.f32.mrf.mxu1 }
0x157a   :  { %v1141_v31 = vadd.f32 %v1140_v30, %v1058_v24 }
0x157b   :  { %v1754_v32 = vpop.f32.mrf.mxu1 }
0x157c   :  { %1812 = vtanh.f32 %v1141_v31 }
0x1589   :  { %v1813_v34 = vpop.eup %1812 }
0x158a   :  { %1149 = vrot.lane.b32.xlu1 %v1813_v34, %s1921_s4  ;;  %v1145_v35 = vmul.f32 0.5, %v1813_v34 }
0x158c   :  { %v1146_v36 = vadd.f32 0.5, %v1145_v35 }
0x158e   :  { %v1147_v39 = vmul.f32 %v1146_v36, %v980_v19 }
0x15fc   :  { %v1150_v37 = vpop.permute.xlu1 %1149 }
0x15fd   :  { %v1152_v38 = vmul.f32 %v1150_v37, %v1146_v36 }
0x15ff   :  { %1154 = vrot.lane.b32.xlu1 %v1152_v38, %s1920_s19 }
0x1671   :  { %v1155_v41 = vpop.permute.xlu1 %1154 }
0x1672   :  { %v1157_v42 = vadd.f32 %v1155_v41, %v1147_v39 }
0x1674   :  { %1814 = vtanh.f32 %v1157_v42 }
0x1681   :  { %v1815_v43 = vpop.eup %1814 }
0x1682   :  { %1160 = vrot.lane.b32.xlu1 %v1815_v43, %s1921_s4 }
0x16f4   :  { %v1161_v44 = vpop.permute.xlu1 %1160 }
0x16f5   :  { %v1163_v45 = vmul.f32 %v1161_v44, %v1146_v36 }
0x16f7   :  { %1165 = vrot.lane.b32.xlu1 %v1163_v45, %s1920_s19 }
0x1769   :  { %v1166_v46 = vpop.permute.xlu1 %1165 }
0x176a   :  { %1642 = vmatmul.mubr.msk.f32.vlgmr.msra.gmra.mxu0 %vm93_vm1, %v1166_v46 }
0x176b   :  { %1375 = vmatpush1.msra.mxu0 %v1977_v4  ;;  %1414 = vmatprep.mubr.f32.mxu0 %v1918_v1 }
0x176c   :  { %1376 = vmatprep.subr.mxu0 %v1980_v5 }
0x176d   :  { %1377 = vmatpush1.msra.mxu0 %v1982_v6 }
0x176e   :  { %1378 = vmatprep.subr.mxu0 %v1988_v8 }
0x176f   :  { %1379 = vmatpush1.msra.mxu0 %v1994_v10 }
0x1770   :  { %1380 = vmatprep.subr.mxu0 %v2000_v12 }
0x1771   :  { %1381 = vmatpush1.msra.mxu0 %v2004_v13 }
0x1772   :  { %1555 = vmatprep.subr.mxu0 %v1975_v3 }
0x182a   :  { %v1235_v47 = vpop.f32.mrf.mxu0 }
0x182c   :  { %v1237_v48 = vpop.f32.mrf.mxu0 }
0x182d   :  { %v2216_v49 = vadd.f32 %v2059_v40, %v1237_v48 }
0x182f   :  { %v1246_v50 = vsel %vm93_vm1, %v2216_v49, -inf }
0x1830   :  { %1247 = vmax.xlane.f32.xlu0 %v1246_v50 }
0x18b9   :  { %v1248_v51 = vpop.xlane.xlu0 %1247 }
0x18ba   :  { %vm1249_vm8 = vcmp.eq.f32.partialorder %v2216_v49, %v1248_v51 }
0x18bb   :  { %v1643_v52 = vsel %vm1249_vm8, 1.0, %v1918_v1 }
0x18bc   :  { %1764 = vmatmul.mubr.msk.f32.vlgmr.msra.gmra.mxu1 %vm93_vm1, %v1643_v52 }
0x18bd   :  { %1767 = vmatpush3.msra.mxu1 %v1984_v7  ;;  %1774 = vmatprep.mubr.msk.f32.mxu1 %vm1919_vm0, %v1918_v1 }
0x18be   :  { %1768 = vmatprep.subr.mxu1 %v1918_v1 }
0x18bf   :  { %1769 = vmatpush3.msra.mxu1 %v1990_v9 }
0x18c0   :  { %1770 = vmatprep.subr.mxu1 %v1918_v1 }
0x18c1   :  { %1771 = vmatpush3.msra.mxu1 %v1996_v11 }
0x18c2   :  { %1772 = vmatprep.subr.mxu1 %v1918_v1 }
0x18c3   :  { %1773 = vmatpush3.msra.mxu1 %v2006_v14 }
0x197c   :  { %v1321_v3 = vpop.f32.mrf.mxu1 }
0x197d   :  { %v1322_v53 = vadd.f32 %v1321_v3, %v1235_v47 }
0x197e   :  { %v1765_v54 = vpop.f32.mrf.mxu1 }
0x197f   :  { %1816 = vtanh.f32 %v1322_v53 }
0x198c   :  { %v1817_v7 = vpop.eup %1816 }
0x198d   :  { %1330 = vrot.lane.b32.xlu1 %v1817_v7, %s1921_s4  ;;  %v1326_v56 = vmul.f32 0.5, %v1817_v7 }
0x198f   :  { %v1327_v57 = vadd.f32 0.5, %v1326_v56 }
0x1991   :  { %v1328_v9 = vmul.f32 %v1327_v57, %v1157_v42 }
0x19ff   :  { %v1331_v58 = vpop.permute.xlu1 %1330 }
0x1a00   :  { %v1333_v59 = vmul.f32 %v1331_v58, %v1327_v57 }
0x1a02   :  { %1335 = vrot.lane.b32.xlu0 %v1333_v59, %s1920_s19 }
0x1a74   :  { %v1336_v60 = vpop.permute.xlu0 %1335 }
0x1a75   :  { %v1338_v11 = vadd.f32 %v1336_v60, %v1328_v9 }
0x1a77   :  { %1818 = vtanh.f32 %v1338_v11 }
0x1a84   :  { %v1819_v61 = vpop.eup %1818 }
0x1a85   :  { %1341 = vrot.lane.b32.xlu1 %v1819_v61, %s1921_s4 }
0x1af7   :  { %v1342_v14 = vpop.permute.xlu1 %1341 }
0x1af8   :  { %v1344_v62 = vmul.f32 %v1342_v14, %v1327_v57 }
0x1afa   :  { %1346 = vrot.lane.b32.xlu1 %v1344_v62, %s1920_s19 }
0x1b6c   :  { %v1347_v0 = vpop.permute.xlu1 %1346 }
0x1b6d   :  { %1645 = vmatmul.mubr.msk.f32.vlgmr.msra.gmra.mxu0 %vm93_vm1, %v1347_v0 }
0x1b6e   :  { %1556 = vmatpush1.msra.mxu0 %v1977_v4  ;;  %1595 = vmatprep.mubr.f32.mxu0 %v1918_v1 }
0x1b6f   :  { %1557 = vmatprep.subr.mxu0 %v1980_v5 }
0x1b70   :  { %1558 = vmatpush1.msra.mxu0 %v1982_v6 }
0x1b71   :  { %1559 = vmatprep.subr.mxu0 %v1988_v8 }
0x1b72   :  { %1560 = vmatpush1.msra.mxu0 %v1994_v10 }
0x1b73   :  { %1561 = vmatprep.subr.mxu0 %v2000_v12 }
0x1b74   :  { %1562 = vmatpush1.msra.mxu0 %v2004_v13 }
0x1c2d   :  { %v1416_v2 = vpop.f32.mrf.mxu0 }
0x1c2f   :  { %v1418_v15 = vpop.f32.mrf.mxu0 }
0x1c30   :  { %v1421_v16 = vadd.f32 %v2059_v40, %v1418_v15 }
0x1c32   :  { %v1427_v4 = vsel %vm93_vm1, %v1421_v16, -inf }
0x1c33   :  { %1428 = vmax.xlane.f32.xlu1 %v1427_v4 }
0x1c44   :  { %701 = vrot.lane.b32.xlu1 %v2123_v33, %s1921_s4 }
0x1cbc   :  { %v1429_v5 = vpop.xlane.xlu1 %1428 }
0x1cbd   :  { %vm1430_vm9 = vcmp.eq.f32.partialorder %v1421_v16, %v1429_v5 }
0x1cbe   :  { %v1646_v6 = vsel %vm1430_vm9, 1.0, %v1918_v1 }
0x1cbf   :  { %1775 = vmatmul.mubr.msk.f32.vlgmr.msra.gmra.mxu1 %vm93_vm1, %v1646_v6 }
0x1cc0   :  { %v702_v27 = vpop.permute.xlu1 %701 }
0x1d7f   :  { %v1502_v8 = vpop.f32.mrf.mxu1 }
0x1d80   :  { %v1503_v10 = vadd.f32 %v1502_v8, %v1416_v2 }
0x1d81   :  { %v1776_v12 = vpop.f32.mrf.mxu1 }
0x1d82   :  { %1820 = vtanh.f32 %v1503_v10 }
0x1d8f   :  { %v1821_v13 = vpop.eup %1820 }
0x1d90   :  { %1511 = vrot.lane.b32.xlu0 %v1821_v13, %s1921_s4  ;;  %v1507_v17 = vmul.f32 0.5, %v1821_v13 }
0x1d92   :  { %v1508_v18 = vadd.f32 0.5, %v1507_v17 }
0x1d94   :  { %v1509_v33 = vmul.f32 %v1508_v18, %v1338_v11 }
0x1e02   :  { %v1512_v19 = vpop.permute.xlu0 %1511 }
0x1e03   :  { %v1514_v20 = vmul.f32 %v1512_v19, %v1508_v18 }
0x1e05   :  { %1516 = vrot.lane.b32.xlu0 %v1514_v20, %s1920_s19 }
0x1e77   :  { %v1517_v21 = vpop.permute.xlu0 %1516 }
0x1e78   :  { %v1519_v22 = vadd.f32 %v1517_v21, %v1509_v33 }
0x1e7a   :  { %1822 = vtanh.f32 %v1519_v22 }
0x1e87   :  { %v1823_v1 = vpop.eup %1822 }
0x1e88   :  { %1522 = vrot.lane.b32.xlu0 %v1823_v1, %s1921_s4 }
0x1efa   :  { %v1523_v23 = vpop.permute.xlu0 %1522 }
0x1efb   :  { %v1525_v24 = vmul.f32 %v1523_v23, %v1508_v18 }
0x1efd   :  { %1527 = vrot.lane.b32.xlu0 %v1525_v24, %s1920_s19 }
0x1f01   :  { %519 = vrot.lane.b32.xlu0 %v2091_v63, %s1920_s19 }
0x1f05   :  { %1242 = vrot.lane.b32.xlu0 %v2216_v49, %s1920_s19 }
0x1f09   :  { %1423 = vrot.lane.b32.xlu0 %v1421_v16, %s1921_s4 }
0x1f0d   :  { %883 = vrot.lane.b32.xlu0 %v2155_v55, %s1922_s5 }
0x1f6f   :  { %v1528_v25 = vpop.permute.xlu0 %1527 }
0x1f70   :  { %1648 = vmatmul.mubr.msk.f32.vlgmr.msra.gmra.mxu0 %vm93_vm1, %v1528_v25 }
0x1f73   :  { %v520_v26 = vpop.permute.xlu0 %519 }
0x1f74   :  { %523 = vst.msk [vmem:[#allocation8] sm:$0xff] %vm522_vm10, %v520_v26 }
0x1f75   :  { %705 = vst.msk [vmem:[#allocation8] sm:$0xff] %vm704_vm11, %v702_v27 }
0x1f77   :  { %v1243_v28 = vpop.permute.xlu0 %1242 }
0x1f78   :  { %1245 = vst.msk [vmem:[#allocation8 + $0x8] sm:$0xff] %vm522_vm10, %v1243_v28 }
0x1f7b   :  { %v1424_v63 = vpop.permute.xlu0 %1423 }
0x1f7c   :  { %1426 = vst.msk [vmem:[#allocation8 + $0x8] sm:$0xff] %vm704_vm11, %v1424_v63 }
0x1f7f   :  { %v884_v29 = vpop.permute.xlu0 %883 }
0x1f80   :  { %887 = vst.msk [vmem:[#allocation8] sm:$0xff] %vm886_vm12, %v884_v29 }
0x2030   :  { %v1597_v30 = vpop.f32.mrf.mxu0 }
0x2032   :  { %v1598_v31 = vpop.f32.mrf.mxu0 }
0x2033   :  { %v1601_v55 = vadd.f32 %v2059_v40, %v1598_v31 }
0x2035   :  { %1603 = vrot.lane.b32.xlu0 %v1601_v55, %s1922_s5 }
0x20a7   :  { %v1604_v32 = vpop.permute.xlu0 %1603 }
0x20a8   :  { %1606 = vst.msk [vmem:[#allocation8 + $0x8] sm:$0xff] %vm886_vm12, %v1604_v32 }
0x20a9   :  { %1895 = shalt.err (!%p1892_p5)
}
0x20aa   :  { %1616 = dma.vmem_to_hbm [thread:$0]  %s1614_s21, 256, %s2272_s6, [#allocation4]  }
0x20ab   :  { %1908 = dma.done.wait [#allocation4], 256  }
0x20ac   :  { %1909 = vsyncadd [#allocation4], 4294967040 }
0x20ad   :  { %1620 = vsyncpa [#allocation3], 1 }
0x20ae   :  { %1621 = vsyncpa [#allocation6], 1 }
0x20af   :  { %1622 = vsyncpa [#allocation4], 1 }

</bundles_post_ra>
